<compile_context>
chip_gen: v5e
topology: v5e:2x2
jax: 0.10.0
libtpu: 0.0.40
codegen_flags: <defaults>
</compile_context>

<pallas_src>
import functools

import jax
import jax.numpy as jnp
from jax.experimental import pallas as pl
from jax.experimental.pallas import tpu as pltpu


_LANE = 128     # lane width: batch tiles / output stores kept 128-dense
_CHUNK = 2048   # intra-tile lane chunk (overlap VPU / MXU / XLU phases)


def _leaky_relu(x, negative_slope):
    # 2 VPU ops (mul + max) instead of 3 (cmp + mul + select).
    # Valid for 0 < negative_slope <= 1 (LeakyReLU default 0.01).
    return jnp.maximum(x, negative_slope * x)


def mlp_kernel(x_ref, w1_ref, b1_ref, w2_ref, b2_ref, w3t_ref, b3_ref, o_ref,
               *, negative_slope):
    w1 = w1_ref[...]            # (H1, input_dim)
    b1 = b1_ref[...]            # (H1, 1)
    w2 = w2_ref[...]            # (H2, H1)  (possibly bf16)
    b2 = b2_ref[...]            # (H2, 1)
    w3t = w3t_ref[...]          # (H2, Od)
    b3 = b3_ref[...]            # (Od, 1)

    input_dim, tb = x_ref.shape

    # Static lane chunks: all slice starts/sizes are Python ints and multiples
    # of 128, so every load/store stays aligned and lane-dense.  Chunking lets
    # the LLO scheduler co-issue VALU (layer 1), vmatmul push (layer 2) and
    # XLU reduce (layer 3) of different chunks instead of serializing phases.
    for s in range(0, tb, _CHUNK):
        e = min(s + _CHUNK, tb)
        x = x_ref[:, s:e]                                   # (input_dim, C)

        # ---- Layer 1: Linear(input_dim -> H1) + LeakyReLU -------------------
        # K = input_dim is tiny (2): VPU broadcast FMAs, not a padded MXU op.
        if input_dim <= 8:
            acc = w1[:, 0:1] * x[0:1, :]
            for k in range(1, input_dim):
                acc = acc + w1[:, k:k + 1] * x[k:k + 1, :]
        else:
            acc = jnp.dot(w1, x, preferred_element_type=jnp.float32)
        h1 = _leaky_relu(acc + b1, negative_slope)           # (H1, C)

        # ---- Layer 2: Linear(H1 -> H2) + LeakyReLU (MXU, lane-dense N) ------
        rhs = h1 if w2.dtype == jnp.float32 else h1.astype(w2.dtype)
        h2 = jnp.dot(w2, rhs, preferred_element_type=jnp.float32)
        h2 = _leaky_relu(h2 + b2, negative_slope)            # (H2, C)

        # ---- Layer 3: Linear(H2 -> output_dim), no activation ---------------
        if w3t.shape[1] == 1:
            # Od = 1: VPU multiply + sublane reduction, skip the MXU entirely.
            out = jnp.sum(w3t * h2, axis=0, keepdims=True)   # (1, C)
        else:
            out = jax.lax.dot_general(w3t, h2, (((0,), (0,)), ((), ())),
                                      preferred_element_type=jnp.float32)
        o_ref[:, s:e] = (out + b3).astype(o_ref.dtype)


def relu_mlp_forward(x, params, negative_slope=0.01, block_batch=8192,
                     x_is_transposed=False, use_bf16_layer2=False):
    """Fused MLP forward.

    x: (batch, input_dim) float32, or (input_dim, batch) if x_is_transposed
       (avoids the host-side transpose for large batches).
    params: PyTorch layout — w: (out_features, in_features), b: (out_features,).
    Returns (batch, output_dim) float32.
    """
    w1, b1, w2, b2, w3, b3 = params
    if x_is_transposed:
        input_dim, batch = x.shape
    else:
        batch, input_dim = x.shape
    h1_dim = w1.shape[0]
    h2_dim = w2.shape[0]
    output_dim = w3.shape[0]

    # Batch tile: always a multiple of 128 (lane-dense stores), large by
    # default (amortize per-grid-step overhead), but capped so the grid keeps
    # >= 2 steps whenever batch spans >= 2 lane tiles (v7x megacore sharding).
    block_batch = max(_LANE, (int(block_batch) // _LANE) * _LANE)
    batch_tiles = pl.cdiv(batch, _LANE)
    tiles_per_step = min(block_batch // _LANE, max(1, pl.cdiv(batch_tiles, 2)))
    tb = tiles_per_step * _LANE
    batch_padded = tb * pl.cdiv(batch, tb)

    # Transposed, lane-dense layout: batch on the last (lane) axis.
    x_t = x if x_is_transposed else x.T
    if batch_padded != batch:
        x_t = jnp.pad(x_t, ((0, 0), (0, batch_padded - batch)))

    b1c = b1.reshape(h1_dim, 1)
    b2c = b2.reshape(h2_dim, 1)
    b3c = b3.reshape(output_dim, 1)
    w3t = w3.T                                       # (H2, output_dim)
    # bf16 operands (f32 accumulation) for the middle matmul only if requested
    # (use on v6e/v7x when a bundle dump shows the MXU-push slot binding).
    w2k = w2.astype(jnp.bfloat16) if use_bf16_layer2 else w2

    grid = (batch_padded // tb,)

    def resident(shape):
        # Same block at every grid step -> stays VMEM resident (no re-DMA).
        return pl.BlockSpec(shape, lambda i: (0, 0))

    kernel = functools.partial(mlp_kernel, negative_slope=negative_slope)

    flops_per_sample = 2 * (input_dim * h1_dim + h1_dim * h2_dim
                            + h2_dim * output_dim)
    cost = pl.CostEstimate(
        flops=flops_per_sample * batch_padded,
        transcendentals=0,
        bytes_accessed=(input_dim + output_dim) * 4 * batch_padded)

    out_t = pl.pallas_call(
        kernel,
        out_shape=jax.ShapeDtypeStruct((output_dim, batch_padded), jnp.float32),
        grid=grid,
        in_specs=[
            pl.BlockSpec((input_dim, tb), lambda i: (0, i)),     # x tile
            resident((h1_dim, input_dim)),                       # w1
            resident((h1_dim, 1)),                               # b1
            resident((h2_dim, h1_dim)),                          # w2
            resident((h2_dim, 1)),                               # b2
            resident((h2_dim, output_dim)),                      # w3^T
            resident((output_dim, 1)),                           # b3
        ],
        out_specs=pl.BlockSpec((output_dim, tb), lambda i: (0, i)),
        compiler_params=pltpu.CompilerParams(
            dimension_semantics=("parallel",),
            vmem_limit_bytes=32 * 1024 * 1024,   # usage is tiny; safe on v7x
        ),
        cost_estimate=cost,
    )(x_t, w1, b1c, w2k, b2c, w3t, b3c)

    return out_t[:, :batch].T                        # back to (batch, output_dim)


def init_params(key, input_dim=2, hidden_units=(64, 32), output_dim=1):
    """Deterministic PyTorch-style (uniform +/- 1/sqrt(fan_in)) init,
    stored in PyTorch layout: w (out, in), b (out,)."""
    dims = [input_dim, *hidden_units, output_dim]
    params = []
    for i in range(len(dims) - 1):
        fan_in, fan_out = dims[i], dims[i + 1]
        key, kw, kb = jax.random.split(key, 3)
        bound = 1.0 / (fan_in ** 0.5)
        w = jax.random.uniform(kw, (fan_out, fan_in), jnp.float32, -bound, bound)
        b = jax.random.uniform(kb, (fan_out,), jnp.float32, -bound, bound)
        params.extend([w, b])
    return tuple(params)


def reference_forward(x, params, negative_slope=0.01):
    w1, b1, w2, b2, w3, b3 = params
    h = jnp.dot(x, w1.T) + b1
    h = jnp.where(h > 0, h, negative_slope * h)
    h = jnp.dot(h, w2.T) + b2
    h = jnp.where(h > 0, h, negative_slope * h)
    return jnp.dot(h, w3.T) + b3


if __name__ == "__main__":
    key = jax.random.PRNGKey(0)
    key, kx = jax.random.split(key)

    batch, input_dim = 8, 2
    x = jax.random.normal(kx, (batch, input_dim), dtype=jnp.float32)

    params = init_params(key, input_dim=input_dim,
                         hidden_units=(64, 32), output_dim=1)

    out = jax.block_until_ready(relu_mlp_forward(x, params, negative_slope=0.01))
    ref = reference_forward(x, params, negative_slope=0.01)
    assert out.shape == (batch, 1)
    assert jnp.allclose(out, ref, atol=1e-4, rtol=1e-4)

    # Multi-grid-step + padded-batch path (tb derived to keep >= 2 steps).
    key, kx2 = jax.random.split(key)
    x2 = jax.random.normal(kx2, (300, input_dim), dtype=jnp.float32)
    out2 = jax.block_until_ready(relu_mlp_forward(x2, params))
    ref2 = reference_forward(x2, params)
    assert out2.shape == (300, 1)
    assert jnp.allclose(out2, ref2, atol=1e-4, rtol=1e-4)

    # Larger batch: exercises the intra-tile lane-chunking path (tb > _CHUNK)
    # with a ragged (but still 128-multiple) final chunk.
    key, kx3 = jax.random.split(key)
    x3 = jax.random.normal(kx3, (5000, input_dim), dtype=jnp.float32)
    out3 = jax.block_until_ready(relu_mlp_forward(x3, params))
    ref3 = reference_forward(x3, params)
    assert out3.shape == (5000, 1)
    assert jnp.allclose(out3, ref3, atol=1e-4, rtol=1e-4)

    print("KERNEL_OK")
</pallas_src>

<mosaic_0001>
module attributes {stable_mosaic.version = 11 : i64} {
  func.func @mlp_kernel(%arg0: i32, %arg1: memref<2x128xf32, #tpu.memory_space<vmem>>, %arg2: memref<64x2xf32, #tpu.memory_space<vmem>>, %arg3: memref<64x1xf32, #tpu.memory_space<vmem>>, %arg4: memref<32x64xf32, #tpu.memory_space<vmem>>, %arg5: memref<32x1xf32, #tpu.memory_space<vmem>>, %arg6: memref<32x1xf32, #tpu.memory_space<vmem>>, %arg7: memref<1x1xf32, #tpu.memory_space<vmem>>, %arg8: memref<1x128xf32, #tpu.memory_space<vmem>>) attributes {dimension_semantics = [#tpu.dimension_semantics<parallel>], iteration_bounds = array<i64: 1>, scalar_prefetch = 0 : i64, scratch_operands = 0 : i64, tpu.core_type = #tpu.core_type<tc>, window_params = [{transform_indices = @transform_0, window_bounds = array<i64: 2, 128>}, {pipeline_mode = #tpu.pipeline_mode<synchronous>, transform_indices = @transform_1, window_bounds = array<i64: 64, 2>}, {pipeline_mode = #tpu.pipeline_mode<synchronous>, transform_indices = @transform_2, window_bounds = array<i64: 64, 1>}, {pipeline_mode = #tpu.pipeline_mode<synchronous>, transform_indices = @transform_3, window_bounds = array<i64: 32, 64>}, {pipeline_mode = #tpu.pipeline_mode<synchronous>, transform_indices = @transform_4, window_bounds = array<i64: 32, 1>}, {pipeline_mode = #tpu.pipeline_mode<synchronous>, transform_indices = @transform_5, window_bounds = array<i64: 32, 1>}, {pipeline_mode = #tpu.pipeline_mode<synchronous>, transform_indices = @transform_6, window_bounds = array<i64: 1, 1>}, {transform_indices = @transform_7, window_bounds = array<i64: 1, 128>}]} {
    %c0 = arith.constant 0 : index
    %c0_0 = arith.constant 0 : index
    %0 = vector.load %arg2[%c0, %c0_0] : memref<64x2xf32, #tpu.memory_space<vmem>>, vector<64x2xf32>
    %c0_1 = arith.constant 0 : index
    %c0_2 = arith.constant 0 : index
    %1 = vector.load %arg3[%c0_1, %c0_2] : memref<64x1xf32, #tpu.memory_space<vmem>>, vector<64x1xf32>
    %c0_3 = arith.constant 0 : index
    %c0_4 = arith.constant 0 : index
    %2 = vector.load %arg4[%c0_3, %c0_4] : memref<32x64xf32, #tpu.memory_space<vmem>>, vector<32x64xf32>
    %c0_5 = arith.constant 0 : index
    %c0_6 = arith.constant 0 : index
    %3 = vector.load %arg5[%c0_5, %c0_6] : memref<32x1xf32, #tpu.memory_space<vmem>>, vector<32x1xf32>
    %c0_7 = arith.constant 0 : index
    %c0_8 = arith.constant 0 : index
    %4 = vector.load %arg6[%c0_7, %c0_8] : memref<32x1xf32, #tpu.memory_space<vmem>>, vector<32x1xf32>
    %c0_9 = arith.constant 0 : index
    %c0_10 = arith.constant 0 : index
    %5 = vector.load %arg7[%c0_9, %c0_10] : memref<1x1xf32, #tpu.memory_space<vmem>>, vector<1x1xf32>
    %c0_11 = arith.constant 0 : index
    %c0_12 = arith.constant 0 : index
    %6 = vector.load %arg1[%c0_11, %c0_12] : memref<2x128xf32, #tpu.memory_space<vmem>>, vector<2x128xf32>
    %7 = vector.extract_strided_slice %0 {offsets = [0, 0], sizes = [64, 1], strides = [1, 1]} : vector<64x2xf32> to vector<64x1xf32>
    %8 = vector.extract_strided_slice %6 {offsets = [0, 0], sizes = [1, 128], strides = [1, 1]} : vector<2x128xf32> to vector<1x128xf32>
    %9 = vector.broadcast %7 : vector<64x1xf32> to vector<64x128xf32>
    %10 = vector.broadcast %8 : vector<1x128xf32> to vector<64x128xf32>
    %11 = arith.mulf %9, %10 : vector<64x128xf32>
    %12 = vector.extract_strided_slice %0 {offsets = [0, 1], sizes = [64, 1], strides = [1, 1]} : vector<64x2xf32> to vector<64x1xf32>
    %13 = vector.extract_strided_slice %6 {offsets = [1, 0], sizes = [1, 128], strides = [1, 1]} : vector<2x128xf32> to vector<1x128xf32>
    %14 = vector.broadcast %12 : vector<64x1xf32> to vector<64x128xf32>
    %15 = vector.broadcast %13 : vector<1x128xf32> to vector<64x128xf32>
    %16 = arith.mulf %14, %15 : vector<64x128xf32>
    %17 = arith.addf %11, %16 : vector<64x128xf32>
    %18 = vector.broadcast %1 : vector<64x1xf32> to vector<64x128xf32>
    %19 = arith.addf %17, %18 : vector<64x128xf32>
    %cst = arith.constant 0.00999999977 : f32
    %20 = vector.broadcast %cst : f32 to vector<64x128xf32>
    %21 = arith.mulf %20, %19 : vector<64x128xf32>
    %22 = arith.maximumf %19, %21 : vector<64x128xf32>
    %cst_13 = arith.constant dense<0.000000e+00> : vector<32x128xf32>
    %23 = tpu.matmul %2, %22, %cst_13 {dimension_numbers = #tpu.dot_dimension_numbers<[1], [0], [0], [1], [0, 0, 1, 1], [], []>} : vector<32x64xf32>, vector<64x128xf32>, vector<32x128xf32> -> vector<32x128xf32>
    %24 = vector.broadcast %3 : vector<32x1xf32> to vector<32x128xf32>
    %25 = arith.addf %23, %24 : vector<32x128xf32>
    %cst_14 = arith.constant 0.00999999977 : f32
    %26 = vector.broadcast %cst_14 : f32 to vector<32x128xf32>
    %27 = arith.mulf %26, %25 : vector<32x128xf32>
    %28 = arith.maximumf %25, %27 : vector<32x128xf32>
    %29 = vector.broadcast %4 : vector<32x1xf32> to vector<32x128xf32>
    %30 = arith.mulf %29, %28 : vector<32x128xf32>
    %cst_15 = arith.constant dense<0.000000e+00> : vector<128xf32>
    %31 = vector.multi_reduction <add>, %30, %cst_15 [0] : vector<32x128xf32> to vector<128xf32>
    %32 = vector.shape_cast %31 : vector<128xf32> to vector<1x128xf32>
    %33 = vector.broadcast %5 : vector<1x1xf32> to vector<1x128xf32>
    %34 = arith.addf %32, %33 : vector<1x128xf32>
    %c0_16 = arith.constant 0 : index
    %c0_17 = arith.constant 0 : index
    %35 = vector.load %arg8[%c0_16, %c0_17] : memref<1x128xf32, #tpu.memory_space<vmem>>, vector<1x128xf32>
    tpu.vector_store %arg8[%c0_16, %c0_17], %34 {strides = array<i32>} : memref<1x128xf32, #tpu.memory_space<vmem>>, vector<1x128xf32>,
    return
  }
  func.func @transform_0(%arg0: i32) -> (i32, i32) {
    %c0_i32 = arith.constant 0 : i32
    %c0_i32_0 = arith.constant 0 : i32
    return %c0_i32, %arg0 : i32, i32
  }
  func.func @transform_1(%arg0: i32) -> (i32, i32) {
    %c0_i32 = arith.constant 0 : i32
    %c0_i32_0 = arith.constant 0 : i32
    %c0_i32_1 = arith.constant 0 : i32
    return %c0_i32, %c0_i32_0 : i32, i32
  }
  func.func @transform_2(%arg0: i32) -> (i32, i32) {
    %c0_i32 = arith.constant 0 : i32
    %c0_i32_0 = arith.constant 0 : i32
    %c0_i32_1 = arith.constant 0 : i32
    return %c0_i32, %c0_i32_0 : i32, i32
  }
  func.func @transform_3(%arg0: i32) -> (i32, i32) {
    %c0_i32 = arith.constant 0 : i32
    %c0_i32_0 = arith.constant 0 : i32
    %c0_i32_1 = arith.constant 0 : i32
    return %c0_i32, %c0_i32_0 : i32, i32
  }
  func.func @transform_4(%arg0: i32) -> (i32, i32) {
    %c0_i32 = arith.constant 0 : i32
    %c0_i32_0 = arith.constant 0 : i32
    %c0_i32_1 = arith.constant 0 : i32
    return %c0_i32, %c0_i32_0 : i32, i32
  }
  func.func @transform_5(%arg0: i32) -> (i32, i32) {
    %c0_i32 = arith.constant 0 : i32
    %c0_i32_0 = arith.constant 0 : i32
    %c0_i32_1 = arith.constant 0 : i32
    return %c0_i32, %c0_i32_0 : i32, i32
  }
  func.func @transform_6(%arg0: i32) -> (i32, i32) {
    %c0_i32 = arith.constant 0 : i32
    %c0_i32_0 = arith.constant 0 : i32
    %c0_i32_1 = arith.constant 0 : i32
    return %c0_i32, %c0_i32_0 : i32, i32
  }
  func.func @transform_7(%arg0: i32) -> (i32, i32) {
    %c0_i32 = arith.constant 0 : i32
    %c0_i32_0 = arith.constant 0 : i32
    return %c0_i32, %arg0 : i32, i32
  }
}

</mosaic_0001>

<bundles_post_ra>
// kernel: tpu_custom_call.1
= control target key start
LH: loop header
LB: loop body
LE: loop exit
PB: predicated region body
PF: predicated region fallthrough
CT: control target
= control target key end

     0   :  { %s570_s0 = inlined_call_operand.vmem [shape: f32[2,128], index: 0, kind: input, shape index: {}]   ;;  %s571_s1 = inlined_call_operand.vmem [shape: f32[64,2], index: 1, kind: input, shape index: {}]   ;;  %s572_s2 = inlined_call_operand.vmem [shape: f32[64,1], index: 2, kind: input, shape index: {}]   ;;  %s573_s3 = inlined_call_operand.vmem [shape: f32[32,64], index: 3, kind: input, shape index: {}]   ;;  %s574_s4 = inlined_call_operand.vmem [shape: f32[32,1], index: 4, kind: input, shape index: {}]   ;;  %s575_s5 = inlined_call_operand.vmem [shape: f32[32,1], index: 5, kind: input, shape index: {}]   ;;  %s576_s6 = inlined_call_operand.<no memory space> [shape: f32[1,1], index: 6, kind: input, shape index: {}]   ;;  %s577_s7 = inlined_call_operand.hbm [shape: f32[1,128], index: 7, kind: output, shape index: {}]  }
   0x1   :  { %v12_v0 = vstv %s576_s6 }
   0x2   :  { %13 = vst [vmem:[#allocation2] sm:$0x1] %v12_v0 }
   0x3   :  { %v36_v1 = vld [vmem:[%s571_s1 + $0x38] sm:$0xff]  ;;  %v35_v2 = vld [vmem:[%s571_s1 + $0x30] sm:$0xff]  ;;  %v34_v3 = vld [vmem:[%s571_s1 + $0x28] sm:$0xff]  ;;  %v414_v4 = vmov 0  }
   0x4   :  { %383 = vset.pattern.permute.xlu2 %v414_v4  ;;  %381 = vset.pattern.permute.xlu1 %v414_v4 }
   0x5   :  { %379 = vset.pattern.permute.xlu0 %v414_v4  ;;  %91 = vperm.xlu1 %381, %v35_v2  }
   0x6   :  { %14 = vsyncpa [#allocation4], 0  ;;  %96 = vperm.xlu0 %379, %v36_v1   ;;  %86 = vperm.xlu2 %383, %v34_v3   ;;  %v415_v5 = vmov 1   ;;  %v33_v6 = vld [vmem:[%s571_s1 + $0x20] sm:$0xff]  ;;  %v44_v7 = vld [vmem:[%s572_s2 + $0x38] sm:$0xff]  ;;  %vm241_vm0 = vcmask 523264  }
   0x7   :  { %v32_v8 = vld [vmem:[%s571_s1 + $0x18] sm:$0xff]  ;;  %v43_v9 = vld [vmem:[%s572_s2 + $0x30] sm:$0xff]  ;;  %v42_v11 = vld [vmem:[%s572_s2 + $0x28] sm:$0xff] }
   0x8   :  { %v31_v10 = vld [vmem:[%s571_s1 + $0x10] sm:$0xff]  ;;  %v30_v12 = vld [vmem:[%s571_s1 + $0x8] sm:$0xff]  ;;  %v41_v13 = vld [vmem:[%s572_s2 + $0x20] sm:$0xff] }
   0x9   :  { %v29_v14 = vld [vmem:[%s571_s1] sm:$0xff]  ;;  %v40_v15 = vld [vmem:[%s572_s2 + $0x18] sm:$0xff]  ;;  %v39_v16 = vld [vmem:[%s572_s2 + $0x10] sm:$0xff]  ;;  %s339_s1 = sshll.u32 %s577_s7, 4  ;;  %s340_s1 = int_to_ptr.hbm [resolvable:$true] %s339_s1 }
   0xa   :  { %v37_v17 = vld [vmem:[%s572_s2] sm:$0xff]  ;;  %v38_v18 = vld [vmem:[%s572_s2 + $0x8] sm:$0xff]  ;;  %v51_v22 = vld [vmem:[%s574_s4 + $0x10] sm:$0xff] }
   0xb   :  { %v49_v19 = vld [vmem:[%s574_s4] sm:$0xff]  ;;  %v50_v21 = vld [vmem:[%s574_s4 + $0x8] sm:$0xff]  ;;  %v56_v23 = vld [vmem:[%s575_s5 + $0x18] sm:$0xff] }
   0xc   :  { %v53_v20 = vld [vmem:[%s575_s5] sm:$0xff]  ;;  %v52_v24 = vld [vmem:[%s574_s4 + $0x18] sm:$0xff]  ;;  %v54_v25 = vld [vmem:[%s575_s5 + $0x8] sm:$0xff] }
   0xd   :  { %382 = vset.pattern.permute.xlu1 %v415_v5  ;;  %v55_v26 = vld [vmem:[%s575_s5 + $0x10] sm:$0xff]  ;;  %v57_v27 = vld [vmem:[#allocation2] sm:$0x1] }
   0xe   :  { %380 = vset.pattern.permute.xlu0 %v415_v5  ;;  %384 = vset.pattern.permute.xlu2 %v415_v5  ;;  %v58_v35 = vld [vmem:[%s570_s0] sm:$0x3] }
   0xf   :  { %137 = vperm.xlu0 %380, %v36_v1   ;;  %133 = vperm.xlu1 %382, %v35_v2   ;;  %v535_v36 = vperm.slane %v58_v35, 1  ;;  %v537_v37 = vperm.slane %v58_v35, 0 }
  0x10   :  { %129 = vperm.xlu2 %384, %v34_v3  }
  0x17   :  { %385 = vset.pattern.permute.xlu1 %v414_v4  ;;  %125 = vperm.xlu0 %380, %v33_v6  }
  0x18   :  { %386 = vset.pattern.permute.xlu2 %v414_v4  ;;  %194 = vperm.xlu1 %385, %v44_v7  }
  0x19   :  { %81 = vperm.xlu2 %386, %v33_v6  }
  0x1f   :  { %121 = vperm.xlu0 %380, %v32_v8  }
  0x20   :  { %189 = vperm.xlu1 %385, %v43_v9  }
  0x21   :  { %76 = vperm.xlu2 %386, %v32_v8  }
  0x27   :  { %117 = vperm.xlu0 %380, %v31_v10  }
  0x28   :  { %184 = vperm.xlu1 %385, %v42_v11  }
  0x29   :  { %71 = vperm.xlu2 %386, %v31_v10  }
  0x2f   :  { %113 = vperm.xlu0 %380, %v30_v12  }
  0x30   :  { %179 = vperm.xlu1 %385, %v41_v13  }
  0x31   :  { %66 = vperm.xlu2 %386, %v30_v12  }
  0x37   :  { %109 = vperm.xlu0 %380, %v29_v14  }
  0x38   :  { %174 = vperm.xlu1 %385, %v40_v15  }
  0x39   :  { %61 = vperm.xlu2 %386, %v29_v14  }
  0x3f   :  { %387 = vset.pattern.permute.xlu0 %v414_v4 }
  0x40   :  { %169 = vperm.xlu1 %385, %v39_v16   ;;  %159 = vperm.xlu0 %387, %v37_v17  }
  0x41   :  { %164 = vperm.xlu2 %386, %v38_v18  }
  0x48   :  { %223 = vperm.xlu1 %385, %v49_v19   ;;  %293 = vperm.xlu0 %387, %v53_v20  }
  0x49   :  { %228 = vperm.xlu2 %386, %v50_v21  }
  0x50   :  { %233 = vperm.xlu1 %385, %v51_v22   ;;  %308 = vperm.xlu0 %387, %v56_v23  }
  0x51   :  { %238 = vperm.xlu2 %386, %v52_v24  }
  0x58   :  { %298 = vperm.xlu1 %385, %v54_v25  }
  0x59   :  { %303 = vperm.xlu2 %386, %v55_v26  }
  0x60   :  { %326 = vperm.xlu1 %385, %v57_v27   ;;  %v87_v28 = vpop.permute.xlu2 %86 }
  0x61   :  { %v105_v54 = vmul.f32 %v537_v37, %v87_v28 }
  0x6a   :  { %v130_v29 = vpop.permute.xlu2 %129 }
  0x6b   :  { %v146_v55 = vmul.f32 %v535_v36, %v130_v29 }
  0x6d   :  { %v154_v59 = vadd.f32 %v146_v55, %v105_v54 }
  0x73   :  { %v82_v32 = vpop.permute.xlu2 %81 }
  0x74   :  { %v104_v63 = vmul.f32 %v537_v37, %v82_v32 }
  0x77   :  { %v92_v30 = vpop.permute.xlu1 %91 }
  0x78   :  { %v97_v31 = vpop.permute.xlu0 %96  ;;  %v106_v47 = vmul.f32 %v537_v37, %v92_v30 }
  0x79   :  { %v107_v39 = vmul.f32 %v537_v37, %v97_v31 }
  0x7b   :  { %v77_v40 = vpop.permute.xlu2 %76 }
  0x7c   :  { %v103_v10 = vmul.f32 %v537_v37, %v77_v40  ;;  %v46_v40 = vld [vmem:[%s573_s3 + $0x8] sm:$0xff] }
  0x81   :  { %v138_v33 = vpop.permute.xlu0 %137  ;;  %v134_v34 = vpop.permute.xlu1 %133 }
  0x82   :  { %v148_v38 = vmul.f32 %v535_v36, %v138_v33  ;;  %v147_v45 = vmul.f32 %v535_v36, %v134_v34 }
  0x83   :  { %v72_v51 = vpop.permute.xlu2 %71 }
  0x84   :  { %v156_v42 = vadd.f32 %v148_v38, %v107_v39  ;;  %v155_v50 = vadd.f32 %v147_v45, %v106_v47  ;;  %v102_v22 = vmul.f32 %v537_v37, %v72_v51  ;;  %v45_v39 = vld [vmem:[%s573_s3] sm:$0xff] }
  0x89   :  { %v126_v41 = vpop.permute.xlu0 %125 }
  0x8a   :  { %v195_v43 = vpop.permute.xlu1 %194  ;;  %v145_v0 = vmul.f32 %v535_v36, %v126_v41  ;;  %v47_v41 = vld [vmem:[%s573_s3 + $0x10] sm:$0xff] }
  0x8b   :  { %v204_v44 = vadd.f32 %v195_v43, %v156_v42  ;;  %v67_v62 = vpop.permute.xlu2 %66  ;;  %v48_v42 = vld [vmem:[%s573_s3 + $0x18] sm:$0xff]  ;;  %s416_s3 = smov [#allocation3]  }
  0x8c   :  { %v153_v4 = vadd.f32 %v145_v0, %v104_v63  ;;  %v101_v16 = vmul.f32 %v537_v37, %v67_v62  ;;  %s337_s8 = sshll.u32 %s416_s3, 4  ;;  %s338_s8 = int_to_ptr.vmem [resolvable:$true] %s337_s8 }
  0x8d   :  { %v212_v46 = vmul.f32 0.01, %v204_v44 }
  0x8f   :  { %v220_v48 = vmax.f32 %v204_v44, %v212_v46 }
  0x91   :  { %262 = vmatpush.msra.mxu0 %v220_v48  ;;  %352 = vmatpush.msra.mxu1 %v220_v48  ;;  %v122_v49 = vpop.permute.xlu0 %121 }
  0x92   :  { %353 = vmatpush.msra.mxu2 %v220_v48  ;;  %354 = vmatpush.msra.mxu3 %v220_v48  ;;  %v190_v52 = vpop.permute.xlu1 %189  ;;  %v144_v7 = vmul.f32 %v535_v36, %v122_v49 }
  0x93   :  { %v203_v53 = vadd.f32 %v190_v52, %v155_v50  ;;  %v62_v9 = vpop.permute.xlu2 %61 }
  0x94   :  { %v152_v14 = vadd.f32 %v144_v7, %v103_v10  ;;  %v100_v23 = vmul.f32 %v537_v37, %v62_v9 }
  0x95   :  { %v211_v56 = vmul.f32 0.01, %v203_v53 }
  0x97   :  { %v219_v57 = vmax.f32 %v203_v53, %v211_v56 }
  0x99   :  { %263 = vmatpush.msra.mxu0 %v219_v57  ;;  %355 = vmatpush.msra.mxu1 %v219_v57  ;;  %v118_v58 = vpop.permute.xlu0 %117 }
  0x9a   :  { %356 = vmatpush.msra.mxu2 %v219_v57  ;;  %357 = vmatpush.msra.mxu3 %v219_v57  ;;  %v185_v60 = vpop.permute.xlu1 %184  ;;  %v143_v18 = vmul.f32 %v535_v36, %v118_v58 }
  0x9b   :  { %v202_v61 = vadd.f32 %v185_v60, %v154_v59  ;;  %v165_v25 = vpop.permute.xlu2 %164 }
  0x9c   :  { %v151_v27 = vadd.f32 %v143_v18, %v102_v22 }
  0x9d   :  { %v210_v1 = vmul.f32 0.01, %v202_v61 }
  0x9f   :  { %v218_v2 = vmax.f32 %v202_v61, %v210_v1 }
  0xa1   :  { %264 = vmatpush.msra.mxu0 %v218_v2  ;;  %358 = vmatpush.msra.mxu1 %v218_v2  ;;  %v114_v3 = vpop.permute.xlu0 %113 }
  0xa2   :  { %359 = vmatpush.msra.mxu2 %v218_v2  ;;  %360 = vmatpush.msra.mxu3 %v218_v2  ;;  %v180_v5 = vpop.permute.xlu1 %179  ;;  %v142_v12 = vmul.f32 %v535_v36, %v114_v3 }
  0xa3   :  { %v201_v6 = vadd.f32 %v180_v5, %v153_v4  ;;  %v229_v44 = vpop.permute.xlu2 %228 }
  0xa4   :  { %v150_v19 = vadd.f32 %v142_v12, %v101_v16 }
  0xa5   :  { %v209_v8 = vmul.f32 0.01, %v201_v6 }
  0xa6   :  { %v198_v26 = vadd.f32 %v165_v25, %v150_v19 }
  0xa7   :  { %v217_v11 = vmax.f32 %v201_v6, %v209_v8 }
  0xa8   :  { %v206_v33 = vmul.f32 0.01, %v198_v26 }
  0xa9   :  { %265 = vmatpush.msra.mxu0 %v217_v11  ;;  %361 = vmatpush.msra.mxu1 %v217_v11  ;;  %v110_v13 = vpop.permute.xlu0 %109 }
  0xaa   :  { %362 = vmatpush.msra.mxu2 %v217_v11  ;;  %363 = vmatpush.msra.mxu3 %v217_v11  ;;  %v175_v15 = vpop.permute.xlu1 %174  ;;  %v141_v20 = vmul.f32 %v535_v36, %v110_v13  ;;  %v214_v38 = vmax.f32 %v198_v26, %v206_v33 }
  0xab   :  { %v200_v17 = vadd.f32 %v175_v15, %v152_v14  ;;  %v239_v50 = vpop.permute.xlu2 %238 }
  0xac   :  { %v149_v28 = vadd.f32 %v141_v20, %v100_v23 }
  0xad   :  { %v208_v21 = vmul.f32 0.01, %v200_v17 }
  0xaf   :  { %v216_v24 = vmax.f32 %v200_v17, %v208_v21 }
  0xb1   :  { %266 = vmatpush.msra.mxu0 %v216_v24  ;;  %364 = vmatpush.msra.mxu1 %v216_v24 }
  0xb2   :  { %365 = vmatpush.msra.mxu2 %v216_v24  ;;  %366 = vmatpush.msra.mxu3 %v216_v24  ;;  %v170_v29 = vpop.permute.xlu1 %169  ;;  %v160_v30 = vpop.permute.xlu0 %159 }
  0xb3   :  { %v199_v31 = vadd.f32 %v170_v29, %v151_v27  ;;  %v197_v32 = vadd.f32 %v160_v30, %v149_v28  ;;  %v304_v3 = vpop.permute.xlu2 %303 }
  0xb5   :  { %v207_v34 = vmul.f32 0.01, %v199_v31  ;;  %v205_v36 = vmul.f32 0.01, %v197_v32 }
  0xb7   :  { %v215_v35 = vmax.f32 %v199_v31, %v207_v34  ;;  %v213_v37 = vmax.f32 %v197_v32, %v205_v36 }
  0xb9   :  { %267 = vmatpush.msra.mxu0 %v215_v35  ;;  %367 = vmatpush.msra.mxu1 %v215_v35 }
  0xba   :  { %368 = vmatpush.msra.mxu2 %v215_v35  ;;  %369 = vmatpush.msra.mxu3 %v215_v35  ;;  %v224_v43 = vpop.permute.xlu1 %223  ;;  %v294_v53 = vpop.permute.xlu0 %293 }
  0xbb   :  { %268 = vmatpush.msra.mxu0 %v214_v38  ;;  %370 = vmatpush.msra.mxu1 %v214_v38 }
  0xbc   :  { %371 = vmatpush.msra.mxu2 %v214_v38  ;;  %372 = vmatpush.msra.mxu3 %v214_v38 }
  0xbd   :  { %269 = vmatpush.msra.mxu0 %v213_v37  ;;  %373 = vmatpush.msra.mxu1 %v213_v37 }
  0xbe   :  { %374 = vmatpush.msra.mxu2 %v213_v37  ;;  %375 = vmatpush.msra.mxu3 %v213_v37 }
  0xbf   :  { %348 = vmatmul.msk.f32.vlgmr.msra.gmra.mxu0 %vm241_vm0, %v45_v39  ;;  %349 = vmatmul.msk.f32.vlgmr.msra.gmra.mxu1 %vm241_vm0, %v46_v40 }
  0xc0   :  { %350 = vmatmul.msk.f32.vlgmr.msra.gmra.mxu2 %vm241_vm0, %v47_v41  ;;  %351 = vmatmul.msk.f32.vlgmr.msra.gmra.mxu3 %vm241_vm0, %v48_v42 }
  0xc2   :  { %v234_v45 = vpop.permute.xlu1 %233  ;;  %v309_v6 = vpop.permute.xlu0 %308 }
  0xca   :  { %v299_v60 = vpop.permute.xlu1 %298 }
  0xd2   :  { %v327_v14 = vpop.permute.xlu1 %326 }
  0xd3   :  { %v329_v16 = vperm.slane %v327_v14, 0 }
 0x13c   :  { %v271_v46 = vpop.f32.mrf.mxu0  ;;  %v274_v47 = vpop.f32.mrf.mxu1 }
 0x13d   :  { %v272_v48 = vadd.f32 %v271_v46, %v224_v43  ;;  %v275_v49 = vadd.f32 %v274_v47, %v229_v44 }
 0x13f   :  { %v283_v51 = vmul.f32 0.01, %v272_v48  ;;  %v284_v52 = vmul.f32 0.01, %v275_v49 }
 0x141   :  { %v287_v54 = vmax.f32 %v272_v48, %v283_v51  ;;  %v288_v55 = vmax.f32 %v275_v49, %v284_v52 }
 0x143   :  { %v277_v56 = vpop.f32.mrf.mxu2  ;;  %v280_v57 = vpop.f32.mrf.mxu3  ;;  %v311_v61 = vmul.f32 %v294_v53, %v287_v54  ;;  %v312_v62 = vmul.f32 %v299_v60, %v288_v55 }
 0x144   :  { %v278_v58 = vadd.f32 %v277_v56, %v234_v45  ;;  %v281_v59 = vadd.f32 %v280_v57, %v239_v50 }
 0x145   :  { %v315_v4 = vadd.f32 %v312_v62, %v311_v61 }
 0x146   :  { %v285_v63 = vmul.f32 0.01, %v278_v58  ;;  %v286_v0 = vmul.f32 0.01, %v281_v59 }
 0x148   :  { %v289_v1 = vmax.f32 %v278_v58, %v285_v63  ;;  %v290_v2 = vmax.f32 %v281_v59, %v286_v0 }
 0x14a   :  { %v313_v5 = vmul.f32 %v304_v3, %v289_v1  ;;  %v314_v8 = vmul.f32 %v309_v6, %v290_v2 }
 0x14c   :  { %v316_v7 = vadd.f32 %v315_v4, %v313_v5 }
 0x14e   :  { %v317_v9 = vadd.f32 %v316_v7, %v314_v8 }
 0x150   :  { %v318_v10 = vrot.slane %v317_v9, 4 }
 0x152   :  { %v319_v11 = vadd.f32 %v318_v10, %v317_v9 }
 0x154   :  { %v320_v12 = vrot.slane %v319_v11, 2 }
 0x156   :  { %v321_v13 = vadd.f32 %v320_v12, %v319_v11 }
 0x158   :  { %v322_v15 = vrot.slane %v321_v13, 1 }
 0x15a   :  { %v323_v17 = vadd.f32 %v322_v15, %v321_v13 }
 0x15c   :  { %v330_v18 = vadd.f32 %v329_v16, %v323_v17 }
 0x15e   :  { %331 = vst [vmem:[#allocation3] sm:$0x1] %v330_v18 }
 0x15f   :  { %342 = dma.vmem_to_hbm [thread:$0]  %s338_s8, 16, %s340_s1, [#allocation4]  }
 0x160   :  { %412 = dma.done.wait [#allocation4], 16  }
 0x161   :  { %413 = vsyncadd [#allocation4], 4294967280 }
 0x162   :  { %347 = vsyncpa [#allocation4], 1 }

</bundles_post_ra>
